<compile_context>
chip_gen: v6e
topology: v6e:2x2x1
jax: 0.10.0
libtpu: 0.0.40
codegen_flags: <defaults>
</compile_context>

<pallas_src>
import functools

import jax
import jax.numpy as jnp
from jax import lax
from jax.experimental import pallas as pl
from jax.experimental.pallas import tpu as pltpu


def _mha_kernel(x_ref, wq_ref, wv_ref, wo_ref, bo_ref, o_ref,
                q_scr, v_scr, ho_scr, *, n_head, head_size):
    T = x_ref.shape[1]
    x = x_ref[0].astype(jnp.bfloat16)                       # (T, M)

    # Fused projections for ALL heads: two wide MXU matmuls (N = H*hs).
    # wq already holds the folded RoPE rotation and hs**-0.25 scale (k == q);
    # wv is the plain K weights (v == K(x) in the module).
    q_scr[...] = jnp.dot(x, wq_ref[...], preferred_element_type=jnp.float32)
    v_scr[...] = jnp.dot(x, wv_ref[...], preferred_element_type=jnp.float32)

    # Hoisted out of the head loop (broadcast_in_dim is not CSE'd by JAX).
    row = lax.broadcasted_iota(jnp.int32, (T, T), 0)
    col = lax.broadcasted_iota(jnp.int32, (T, T), 1)
    neg_inf = jnp.float32(-jnp.inf)

    # Per-head attention (scores / softmax / PV only).  n_head is small and each
    # head's intermediates die into a scratch store, so live ranges stay bounded.
    for h in range(n_head):
        sl = pl.ds(h * head_size, head_size)
        qh = q_scr[:, sl].astype(jnp.bfloat16)              # (T, hs) rotated+scaled
        vh = v_scr[:, sl].astype(jnp.bfloat16)              # (T, hs) un-rotated values
        # scores = (q*hs**-0.25) @ (q*hs**-0.25)^T == (q @ q^T) * hs**-0.5
        w = lax.dot_general(qh, qh, (((1,), (1,)), ((), ())),
                            preferred_element_type=jnp.float32)
        w = jnp.where(col > row, neg_inf, w)                # causal (triu, diag=1)
        m = jnp.max(w, axis=-1, keepdims=True)
        e = jnp.exp(w - m)
        p = e * pl.reciprocal(jnp.sum(e, axis=-1, keepdims=True), approx=True)
        ho_scr[:, sl] = jnp.dot(p.astype(jnp.bfloat16), vh,
                                preferred_element_type=jnp.float32)

    # Fused output projection across all heads: one (T, H*hs) @ (H*hs, M) matmul.
    out = jnp.dot(ho_scr[...].astype(jnp.bfloat16), wo_ref[...],
                  preferred_element_type=jnp.float32) + bo_ref[...]
    o_ref[0] = out.astype(o_ref.dtype)


def multi_head_attention(x, wq_all, wv_all, wo_t, bo, *, n_head, head_size):
    B, T, M = x.shape
    HD = n_head * head_size
    kernel = functools.partial(_mha_kernel, n_head=n_head, head_size=head_size)
    return pl.pallas_call(
        kernel,
        out_shape=jax.ShapeDtypeStruct((B, T, M), x.dtype),
        grid_spec=pltpu.PrefetchScalarGridSpec(
            num_scalar_prefetch=0,
            grid=(B,),
            in_specs=[
                pl.BlockSpec((1, T, M), lambda b: (b, 0, 0)),   # x
                pl.BlockSpec((M, HD), lambda b: (0, 0)),        # Wq_all (bf16)
                pl.BlockSpec((M, HD), lambda b: (0, 0)),        # Wv_all (bf16)
                pl.BlockSpec((HD, M), lambda b: (0, 0)),        # Wo^T   (bf16)
                pl.BlockSpec((1, M), lambda b: (0, 0)),         # bias   (f32)
            ],
            out_specs=pl.BlockSpec((1, T, M), lambda b: (b, 0, 0)),
            scratch_shapes=[
                pltpu.VMEM((T, HD), jnp.float32),   # rotated+scaled q (== k)
                pltpu.VMEM((T, HD), jnp.float32),   # v
                pltpu.VMEM((T, HD), jnp.float32),   # concatenated head outputs
            ],
        ),
        compiler_params=pltpu.CompilerParams(dimension_semantics=("parallel",)),
    )(x, wq_all, wv_all, wo_t, bo)


if __name__ == "__main__":
    # Scaled-down config consistent with the module: n_model=32, n_head=4,
    # head_size=8 (n_head*head_size == n_model), seq_len=8, batch=2.
    B, T, M, H, HS = 2, 8, 32, 4, 8

    key = jax.random.PRNGKey(0)
    kx, kk, kw, kb = jax.random.split(key, 4)
    x = jax.random.normal(kx, (B, T, M), jnp.float32)
    wk = jax.random.normal(kk, (H, HS, M), jnp.float32) * (1.0 / jnp.sqrt(M))        # per-head K.weight
    wo = jax.random.normal(kw, (M, H * HS), jnp.float32) * (1.0 / jnp.sqrt(H * HS))  # linear.weight
    bo = jax.random.normal(kb, (M,), jnp.float32) * 0.1                              # linear.bias

    # Position-independent "RoPE" constants exactly as in the module.
    half = HS // 2
    thetas = 10000.0 ** (-(jnp.arange(half, dtype=jnp.float32) / half))
    cosv, sinv = jnp.cos(thetas), jnp.sin(thetas)

    # Fold the module's in-place even/odd update into a (hs, hs) matrix R so that
    # rotated = a @ R; the odd lane uses the ALREADY-UPDATED even lane:
    #   new[2i]   = a[2i]*cos[i]          + a[2i+1]*sin[i]
    #   new[2i+1] = -a[2i]*cos[i]*sin[i]  + a[2i+1]*(cos[i] - sin[i]**2)
    ev = 2 * jnp.arange(half)
    od = ev + 1
    R = jnp.zeros((HS, HS), jnp.float32)
    R = R.at[ev, ev].set(cosv)
    R = R.at[od, ev].set(sinv)
    R = R.at[ev, od].set(-cosv * sinv)
    R = R.at[od, od].set(cosv - sinv ** 2)

    # Host-side weight prep (f32 math, single bf16 cast for the MXU):
    #   Wv_all[:, h*hs:(h+1)*hs] = wk[h]^T                   (values = K(x))
    #   Wq_all[:, h*hs:(h+1)*hs] = wk[h]^T @ R * hs**-0.25   (rotated, sqrt(scale) folded)
    wv_all = jnp.transpose(wk, (2, 0, 1)).reshape(M, H * HS)             # (M, H*hs)
    wq3 = jnp.einsum('hdm,df->hmf', wk, R)                               # (H, M, hs)
    wq_all = (jnp.transpose(wq3, (1, 0, 2)).reshape(M, H * HS) * HS ** -0.25)
    wq_all = wq_all.astype(jnp.bfloat16)
    wv_all = wv_all.astype(jnp.bfloat16)
    wo_t = jnp.transpose(wo, (1, 0)).astype(jnp.bfloat16)                # (H*hs, M)
    bo2 = bo.reshape(1, M)

    out = multi_head_attention(x, wq_all, wv_all, wo_t, bo2, n_head=H, head_size=HS)
    out = jax.block_until_ready(out)

    # Pure-JAX f32 reference mirroring the PyTorch forward (eval mode).
    def ref(xr):
        outs = []
        for h in range(H):
            a = xr @ wk[h].T
            e_, o_ = a[..., ::2], a[..., 1::2]
            e_new = e_ * cosv + o_ * sinv
            o_new = -e_new * sinv + o_ * cosv          # uses already-updated even slice
            k = jnp.stack([e_new, o_new], axis=-1).reshape(a.shape)
            w = jnp.einsum('...ik,...jk->...ij', k, k) * HS ** -0.5
            mask = jnp.where(jnp.triu(jnp.ones((T, T), dtype=bool), k=1), -jnp.inf, 0.0)
            w = jax.nn.softmax(w + mask, axis=-1)
            outs.append(jnp.einsum('...ij,...jk->...ik', w, a))
        return jnp.concatenate(outs, axis=-1) @ wo.T + bo

    expected = ref(x)
    max_err = float(jnp.max(jnp.abs(out - expected)))
    # bf16 MXU inputs (f32 accumulation) + approx reciprocal => ~1e-2 level error.
    assert jnp.allclose(out, expected, rtol=3e-2, atol=3e-2), max_err
    print("KERNEL_OK")
</pallas_src>

<mosaic_0001>
module attributes {stable_mosaic.version = 11 : i64} {
  func.func @_mha_kernel(%arg0: i32, %arg1: memref<1x8x32xf32, #tpu.memory_space<vmem>>, %arg2: memref<32x32xbf16, #tpu.memory_space<vmem>>, %arg3: memref<32x32xbf16, #tpu.memory_space<vmem>>, %arg4: memref<32x32xbf16, #tpu.memory_space<vmem>>, %arg5: memref<1x32xf32, #tpu.memory_space<vmem>>, %arg6: memref<1x8x32xf32, #tpu.memory_space<vmem>>, %arg7: memref<8x32xf32, #tpu.memory_space<vmem>>, %arg8: memref<8x32xf32, #tpu.memory_space<vmem>>, %arg9: memref<8x32xf32, #tpu.memory_space<vmem>>) attributes {dimension_semantics = [#tpu.dimension_semantics<parallel>], iteration_bounds = array<i64: 2>, scalar_prefetch = 0 : i64, scratch_operands = 3 : i64, tpu.core_type = #tpu.core_type<tc>, window_params = [{transform_indices = @transform_0, window_bounds = array<i64: 1, 8, 32>}, {pipeline_mode = #tpu.pipeline_mode<synchronous>, transform_indices = @transform_1, window_bounds = array<i64: 32, 32>}, {pipeline_mode = #tpu.pipeline_mode<synchronous>, transform_indices = @transform_2, window_bounds = array<i64: 32, 32>}, {pipeline_mode = #tpu.pipeline_mode<synchronous>, transform_indices = @transform_3, window_bounds = array<i64: 32, 32>}, {pipeline_mode = #tpu.pipeline_mode<synchronous>, transform_indices = @transform_4, window_bounds = array<i64: 1, 32>}, {transform_indices = @transform_5, window_bounds = array<i64: 1, 8, 32>}]} {
    %c0 = arith.constant 0 : index
    %c0_0 = arith.constant 0 : index
    %c0_1 = arith.constant 0 : index
    %0 = vector.load %arg1[%c0, %c0_0, %c0_1] : memref<1x8x32xf32, #tpu.memory_space<vmem>>, vector<1x8x32xf32>
    %1 = vector.shape_cast %0 : vector<1x8x32xf32> to vector<8x32xf32>
    %2 = arith.truncf %1 : vector<8x32xf32> to vector<8x32xbf16>
    %c0_2 = arith.constant 0 : index
    %c0_3 = arith.constant 0 : index
    %3 = vector.load %arg2[%c0_2, %c0_3] : memref<32x32xbf16, #tpu.memory_space<vmem>>, vector<32x32xbf16>
    %cst = arith.constant dense<0.000000e+00> : vector<8x32xf32>
    %4 = tpu.matmul %2, %3, %cst {dimension_numbers = #tpu.dot_dimension_numbers<[1], [0], [0], [1], [0, 0, 1, 1], [], []>} : vector<8x32xbf16>, vector<32x32xbf16>, vector<8x32xf32> -> vector<8x32xf32>
    %c0_4 = arith.constant 0 : index
    %c0_5 = arith.constant 0 : index
    %5 = vector.load %arg7[%c0_4, %c0_5] : memref<8x32xf32, #tpu.memory_space<vmem>>, vector<8x32xf32>
    tpu.vector_store %arg7[%c0_4, %c0_5], %4 {strides = array<i32>} : memref<8x32xf32, #tpu.memory_space<vmem>>, vector<8x32xf32>,
    %c0_6 = arith.constant 0 : index
    %c0_7 = arith.constant 0 : index
    %6 = vector.load %arg3[%c0_6, %c0_7] : memref<32x32xbf16, #tpu.memory_space<vmem>>, vector<32x32xbf16>
    %cst_8 = arith.constant dense<0.000000e+00> : vector<8x32xf32>
    %7 = tpu.matmul %2, %6, %cst_8 {dimension_numbers = #tpu.dot_dimension_numbers<[1], [0], [0], [1], [0, 0, 1, 1], [], []>} : vector<8x32xbf16>, vector<32x32xbf16>, vector<8x32xf32> -> vector<8x32xf32>
    %c0_9 = arith.constant 0 : index
    %c0_10 = arith.constant 0 : index
    %8 = vector.load %arg8[%c0_9, %c0_10] : memref<8x32xf32, #tpu.memory_space<vmem>>, vector<8x32xf32>
    tpu.vector_store %arg8[%c0_9, %c0_10], %7 {strides = array<i32>} : memref<8x32xf32, #tpu.memory_space<vmem>>, vector<8x32xf32>,
    %9 = tpu.iota {dimensions = array<i32: 0>} : vector<8x8xi32>
    %10 = tpu.iota {dimensions = array<i32: 1>} : vector<8x8xi32>
    %c0_11 = arith.constant 0 : index
    %c0_12 = arith.constant 0 : index
    %11 = vector.load %arg7[%c0_11, %c0_12] : memref<8x32xf32, #tpu.memory_space<vmem>>, vector<8x8xf32>
    %12 = arith.truncf %11 : vector<8x8xf32> to vector<8x8xbf16>
    %c0_13 = arith.constant 0 : index
    %c0_14 = arith.constant 0 : index
    %13 = vector.load %arg8[%c0_13, %c0_14] : memref<8x32xf32, #tpu.memory_space<vmem>>, vector<8x8xf32>
    %14 = arith.truncf %13 : vector<8x8xf32> to vector<8x8xbf16>
    %cst_15 = arith.constant dense<0.000000e+00> : vector<8x8xf32>
    %15 = tpu.matmul %12, %12, %cst_15 {dimension_numbers = #tpu.dot_dimension_numbers<[1], [1], [0], [0], [0, 0, 1, 0], [], []>} : vector<8x8xbf16>, vector<8x8xbf16>, vector<8x8xf32> -> vector<8x8xf32>
    %16 = arith.cmpi sgt, %10, %9 : vector<8x8xi32>
    %cst_16 = arith.constant 0xFF800000 : f32
    %17 = vector.broadcast %cst_16 : f32 to vector<8x8xf32>
    %18 = arith.select %16, %17, %15 : vector<8x8xi1>, vector<8x8xf32>
    %cst_17 = arith.constant dense<0xFF800000> : vector<8xf32>
    %19 = vector.multi_reduction <maximumf>, %18, %cst_17 [1] : vector<8x8xf32> to vector<8xf32>
    %20 = vector.shape_cast %19 : vector<8xf32> to vector<8x1xf32>
    %21 = vector.broadcast %20 : vector<8x1xf32> to vector<8x8xf32>
    %22 = arith.subf %18, %21 : vector<8x8xf32>
    %23 = math.exp %22 : vector<8x8xf32>
    %cst_18 = arith.constant dense<0.000000e+00> : vector<8xf32>
    %24 = vector.multi_reduction <add>, %23, %cst_18 [1] : vector<8x8xf32> to vector<8xf32>
    %25 = vector.shape_cast %24 : vector<8xf32> to vector<8x1xf32>
    %26 = tpu.reciprocal %25 {approx = true} : vector<8x1xf32> -> vector<8x1xf32>
    %27 = vector.broadcast %26 : vector<8x1xf32> to vector<8x8xf32>
    %28 = arith.mulf %23, %27 : vector<8x8xf32>
    %29 = arith.truncf %28 : vector<8x8xf32> to vector<8x8xbf16>
    %cst_19 = arith.constant dense<0.000000e+00> : vector<8x8xf32>
    %30 = tpu.matmul %29, %14, %cst_19 {dimension_numbers = #tpu.dot_dimension_numbers<[1], [0], [0], [1], [0, 0, 1, 1], [], []>} : vector<8x8xbf16>, vector<8x8xbf16>, vector<8x8xf32> -> vector<8x8xf32>
    %c0_20 = arith.constant 0 : index
    %c0_21 = arith.constant 0 : index
    %31 = vector.load %arg9[%c0_20, %c0_21] : memref<8x32xf32, #tpu.memory_space<vmem>>, vector<8x8xf32>
    tpu.vector_store %arg9[%c0_20, %c0_21], %30 {strides = array<i32>} : memref<8x32xf32, #tpu.memory_space<vmem>>, vector<8x8xf32>,
    %c0_22 = arith.constant 0 : index
    %c8 = arith.constant 8 : index
    %32 = vector.load %arg7[%c0_22, %c8] : memref<8x32xf32, #tpu.memory_space<vmem>>, vector<8x8xf32>
    %33 = arith.truncf %32 : vector<8x8xf32> to vector<8x8xbf16>
    %c0_23 = arith.constant 0 : index
    %c8_24 = arith.constant 8 : index
    %34 = vector.load %arg8[%c0_23, %c8_24] : memref<8x32xf32, #tpu.memory_space<vmem>>, vector<8x8xf32>
    %35 = arith.truncf %34 : vector<8x8xf32> to vector<8x8xbf16>
    %cst_25 = arith.constant dense<0.000000e+00> : vector<8x8xf32>
    %36 = tpu.matmul %33, %33, %cst_25 {dimension_numbers = #tpu.dot_dimension_numbers<[1], [1], [0], [0], [0, 0, 1, 0], [], []>} : vector<8x8xbf16>, vector<8x8xbf16>, vector<8x8xf32> -> vector<8x8xf32>
    %37 = arith.cmpi sgt, %10, %9 : vector<8x8xi32>
    %cst_26 = arith.constant 0xFF800000 : f32
    %38 = vector.broadcast %cst_26 : f32 to vector<8x8xf32>
    %39 = arith.select %37, %38, %36 : vector<8x8xi1>, vector<8x8xf32>
    %cst_27 = arith.constant dense<0xFF800000> : vector<8xf32>
    %40 = vector.multi_reduction <maximumf>, %39, %cst_27 [1] : vector<8x8xf32> to vector<8xf32>
    %41 = vector.shape_cast %40 : vector<8xf32> to vector<8x1xf32>
    %42 = vector.broadcast %41 : vector<8x1xf32> to vector<8x8xf32>
    %43 = arith.subf %39, %42 : vector<8x8xf32>
    %44 = math.exp %43 : vector<8x8xf32>
    %cst_28 = arith.constant dense<0.000000e+00> : vector<8xf32>
    %45 = vector.multi_reduction <add>, %44, %cst_28 [1] : vector<8x8xf32> to vector<8xf32>
    %46 = vector.shape_cast %45 : vector<8xf32> to vector<8x1xf32>
    %47 = tpu.reciprocal %46 {approx = true} : vector<8x1xf32> -> vector<8x1xf32>
    %48 = vector.broadcast %47 : vector<8x1xf32> to vector<8x8xf32>
    %49 = arith.mulf %44, %48 : vector<8x8xf32>
    %50 = arith.truncf %49 : vector<8x8xf32> to vector<8x8xbf16>
    %cst_29 = arith.constant dense<0.000000e+00> : vector<8x8xf32>
    %51 = tpu.matmul %50, %35, %cst_29 {dimension_numbers = #tpu.dot_dimension_numbers<[1], [0], [0], [1], [0, 0, 1, 1], [], []>} : vector<8x8xbf16>, vector<8x8xbf16>, vector<8x8xf32> -> vector<8x8xf32>
    %c0_30 = arith.constant 0 : index
    %c8_31 = arith.constant 8 : index
    %52 = vector.load %arg9[%c0_30, %c8_31] : memref<8x32xf32, #tpu.memory_space<vmem>>, vector<8x8xf32>
    tpu.vector_store %arg9[%c0_30, %c8_31], %51 {strides = array<i32>} : memref<8x32xf32, #tpu.memory_space<vmem>>, vector<8x8xf32>,
    %c0_32 = arith.constant 0 : index
    %c16 = arith.constant 16 : index
    %53 = vector.load %arg7[%c0_32, %c16] : memref<8x32xf32, #tpu.memory_space<vmem>>, vector<8x8xf32>
    %54 = arith.truncf %53 : vector<8x8xf32> to vector<8x8xbf16>
    %c0_33 = arith.constant 0 : index
    %c16_34 = arith.constant 16 : index
    %55 = vector.load %arg8[%c0_33, %c16_34] : memref<8x32xf32, #tpu.memory_space<vmem>>, vector<8x8xf32>
    %56 = arith.truncf %55 : vector<8x8xf32> to vector<8x8xbf16>
    %cst_35 = arith.constant dense<0.000000e+00> : vector<8x8xf32>
    %57 = tpu.matmul %54, %54, %cst_35 {dimension_numbers = #tpu.dot_dimension_numbers<[1], [1], [0], [0], [0, 0, 1, 0], [], []>} : vector<8x8xbf16>, vector<8x8xbf16>, vector<8x8xf32> -> vector<8x8xf32>
    %58 = arith.cmpi sgt, %10, %9 : vector<8x8xi32>
    %cst_36 = arith.constant 0xFF800000 : f32
    %59 = vector.broadcast %cst_36 : f32 to vector<8x8xf32>
    %60 = arith.select %58, %59, %57 : vector<8x8xi1>, vector<8x8xf32>
    %cst_37 = arith.constant dense<0xFF800000> : vector<8xf32>
    %61 = vector.multi_reduction <maximumf>, %60, %cst_37 [1] : vector<8x8xf32> to vector<8xf32>
    %62 = vector.shape_cast %61 : vector<8xf32> to vector<8x1xf32>
    %63 = vector.broadcast %62 : vector<8x1xf32> to vector<8x8xf32>
    %64 = arith.subf %60, %63 : vector<8x8xf32>
    %65 = math.exp %64 : vector<8x8xf32>
    %cst_38 = arith.constant dense<0.000000e+00> : vector<8xf32>
    %66 = vector.multi_reduction <add>, %65, %cst_38 [1] : vector<8x8xf32> to vector<8xf32>
    %67 = vector.shape_cast %66 : vector<8xf32> to vector<8x1xf32>
    %68 = tpu.reciprocal %67 {approx = true} : vector<8x1xf32> -> vector<8x1xf32>
    %69 = vector.broadcast %68 : vector<8x1xf32> to vector<8x8xf32>
    %70 = arith.mulf %65, %69 : vector<8x8xf32>
    %71 = arith.truncf %70 : vector<8x8xf32> to vector<8x8xbf16>
    %cst_39 = arith.constant dense<0.000000e+00> : vector<8x8xf32>
    %72 = tpu.matmul %71, %56, %cst_39 {dimension_numbers = #tpu.dot_dimension_numbers<[1], [0], [0], [1], [0, 0, 1, 1], [], []>} : vector<8x8xbf16>, vector<8x8xbf16>, vector<8x8xf32> -> vector<8x8xf32>
    %c0_40 = arith.constant 0 : index
    %c16_41 = arith.constant 16 : index
    %73 = vector.load %arg9[%c0_40, %c16_41] : memref<8x32xf32, #tpu.memory_space<vmem>>, vector<8x8xf32>
    tpu.vector_store %arg9[%c0_40, %c16_41], %72 {strides = array<i32>} : memref<8x32xf32, #tpu.memory_space<vmem>>, vector<8x8xf32>,
    %c0_42 = arith.constant 0 : index
    %c24 = arith.constant 24 : index
    %74 = vector.load %arg7[%c0_42, %c24] : memref<8x32xf32, #tpu.memory_space<vmem>>, vector<8x8xf32>
    %75 = arith.truncf %74 : vector<8x8xf32> to vector<8x8xbf16>
    %c0_43 = arith.constant 0 : index
    %c24_44 = arith.constant 24 : index
    %76 = vector.load %arg8[%c0_43, %c24_44] : memref<8x32xf32, #tpu.memory_space<vmem>>, vector<8x8xf32>
    %77 = arith.truncf %76 : vector<8x8xf32> to vector<8x8xbf16>
    %cst_45 = arith.constant dense<0.000000e+00> : vector<8x8xf32>
    %78 = tpu.matmul %75, %75, %cst_45 {dimension_numbers = #tpu.dot_dimension_numbers<[1], [1], [0], [0], [0, 0, 1, 0], [], []>} : vector<8x8xbf16>, vector<8x8xbf16>, vector<8x8xf32> -> vector<8x8xf32>
    %79 = arith.cmpi sgt, %10, %9 : vector<8x8xi32>
    %cst_46 = arith.constant 0xFF800000 : f32
    %80 = vector.broadcast %cst_46 : f32 to vector<8x8xf32>
    %81 = arith.select %79, %80, %78 : vector<8x8xi1>, vector<8x8xf32>
    %cst_47 = arith.constant dense<0xFF800000> : vector<8xf32>
    %82 = vector.multi_reduction <maximumf>, %81, %cst_47 [1] : vector<8x8xf32> to vector<8xf32>
    %83 = vector.shape_cast %82 : vector<8xf32> to vector<8x1xf32>
    %84 = vector.broadcast %83 : vector<8x1xf32> to vector<8x8xf32>
    %85 = arith.subf %81, %84 : vector<8x8xf32>
    %86 = math.exp %85 : vector<8x8xf32>
    %cst_48 = arith.constant dense<0.000000e+00> : vector<8xf32>
    %87 = vector.multi_reduction <add>, %86, %cst_48 [1] : vector<8x8xf32> to vector<8xf32>
    %88 = vector.shape_cast %87 : vector<8xf32> to vector<8x1xf32>
    %89 = tpu.reciprocal %88 {approx = true} : vector<8x1xf32> -> vector<8x1xf32>
    %90 = vector.broadcast %89 : vector<8x1xf32> to vector<8x8xf32>
    %91 = arith.mulf %86, %90 : vector<8x8xf32>
    %92 = arith.truncf %91 : vector<8x8xf32> to vector<8x8xbf16>
    %cst_49 = arith.constant dense<0.000000e+00> : vector<8x8xf32>
    %93 = tpu.matmul %92, %77, %cst_49 {dimension_numbers = #tpu.dot_dimension_numbers<[1], [0], [0], [1], [0, 0, 1, 1], [], []>} : vector<8x8xbf16>, vector<8x8xbf16>, vector<8x8xf32> -> vector<8x8xf32>
    %c0_50 = arith.constant 0 : index
    %c24_51 = arith.constant 24 : index
    %94 = vector.load %arg9[%c0_50, %c24_51] : memref<8x32xf32, #tpu.memory_space<vmem>>, vector<8x8xf32>
    tpu.vector_store %arg9[%c0_50, %c24_51], %93 {strides = array<i32>} : memref<8x32xf32, #tpu.memory_space<vmem>>, vector<8x8xf32>,
    %c0_52 = arith.constant 0 : index
    %c0_53 = arith.constant 0 : index
    %95 = vector.load %arg9[%c0_52, %c0_53] : memref<8x32xf32, #tpu.memory_space<vmem>>, vector<8x32xf32>
    %96 = arith.truncf %95 : vector<8x32xf32> to vector<8x32xbf16>
    %c0_54 = arith.constant 0 : index
    %c0_55 = arith.constant 0 : index
    %97 = vector.load %arg4[%c0_54, %c0_55] : memref<32x32xbf16, #tpu.memory_space<vmem>>, vector<32x32xbf16>
    %cst_56 = arith.constant dense<0.000000e+00> : vector<8x32xf32>
    %98 = tpu.matmul %96, %97, %cst_56 {dimension_numbers = #tpu.dot_dimension_numbers<[1], [0], [0], [1], [0, 0, 1, 1], [], []>} : vector<8x32xbf16>, vector<32x32xbf16>, vector<8x32xf32> -> vector<8x32xf32>
    %c0_57 = arith.constant 0 : index
    %c0_58 = arith.constant 0 : index
    %99 = vector.load %arg5[%c0_57, %c0_58] : memref<1x32xf32, #tpu.memory_space<vmem>>, vector<1x32xf32>
    %100 = vector.broadcast %99 : vector<1x32xf32> to vector<8x32xf32>
    %101 = arith.addf %98, %100 : vector<8x32xf32>
    %c0_59 = arith.constant 0 : index
    %c0_60 = arith.constant 0 : index
    %c0_61 = arith.constant 0 : index
    %102 = vector.load %arg6[%c0_59, %c0_60, %c0_61] : memref<1x8x32xf32, #tpu.memory_space<vmem>>, vector<1x8x32xf32>
    %103 = vector.shape_cast %102 : vector<1x8x32xf32> to vector<8x32xf32>
    %104 = vector.shape_cast %101 : vector<8x32xf32> to vector<1x8x32xf32>
    tpu.vector_store %arg6[%c0_59, %c0_60, %c0_61], %104 {strides = array<i32>} : memref<1x8x32xf32, #tpu.memory_space<vmem>>, vector<1x8x32xf32>,
    return
  }
  func.func @transform_0(%arg0: i32) -> (i32, i32, i32) {
    %c0_i32 = arith.constant 0 : i32
    %c0_i32_0 = arith.constant 0 : i32
    %c0_i32_1 = arith.constant 0 : i32
    return %arg0, %c0_i32, %c0_i32_0 : i32, i32, i32
  }
  func.func @transform_1(%arg0: i32) -> (i32, i32) {
    %c0_i32 = arith.constant 0 : i32
    %c0_i32_0 = arith.constant 0 : i32
    %c0_i32_1 = arith.constant 0 : i32
    return %c0_i32, %c0_i32_0 : i32, i32
  }
  func.func @transform_2(%arg0: i32) -> (i32, i32) {
    %c0_i32 = arith.constant 0 : i32
    %c0_i32_0 = arith.constant 0 : i32
    %c0_i32_1 = arith.constant 0 : i32
    return %c0_i32, %c0_i32_0 : i32, i32
  }
  func.func @transform_3(%arg0: i32) -> (i32, i32) {
    %c0_i32 = arith.constant 0 : i32
    %c0_i32_0 = arith.constant 0 : i32
    %c0_i32_1 = arith.constant 0 : i32
    return %c0_i32, %c0_i32_0 : i32, i32
  }
  func.func @transform_4(%arg0: i32) -> (i32, i32) {
    %c0_i32 = arith.constant 0 : i32
    %c0_i32_0 = arith.constant 0 : i32
    %c0_i32_1 = arith.constant 0 : i32
    return %c0_i32, %c0_i32_0 : i32, i32
  }
  func.func @transform_5(%arg0: i32) -> (i32, i32, i32) {
    %c0_i32 = arith.constant 0 : i32
    %c0_i32_0 = arith.constant 0 : i32
    %c0_i32_1 = arith.constant 0 : i32
    return %arg0, %c0_i32, %c0_i32_0 : i32, i32, i32
  }
}

</mosaic_0001>

<bundles_post_ra>
// kernel: tpu_custom_call.1
= control target key start
LH: loop header
LB: loop body
LE: loop exit
PB: predicated region body
PF: predicated region fallthrough
CT: control target
= control target key end

     0   :  { %10 = vsyncpa [#allocation6], 0  ;;  %s1795_s0 = inlined_call_operand.hbm [shape: f32[2,8,32], index: 0, kind: input, shape index: {}]   ;;  %s1796_s1 = inlined_call_operand.hbm [shape: bf16[32,32], index: 1, kind: input, shape index: {}]   ;;  %s1797_s2 = inlined_call_operand.hbm [shape: bf16[32,32], index: 2, kind: input, shape index: {}]   ;;  %s1798_s3 = inlined_call_operand.hbm [shape: bf16[32,32], index: 3, kind: input, shape index: {}]   ;;  %s1799_s4 = inlined_call_operand.vmem [shape: f32[1,32], index: 4, kind: input, shape index: {}]   ;;  %s1800_s5 = inlined_call_operand.hbm [shape: f32[2,8,32], index: 5, kind: output, shape index: {}]  }
   0x1   :  { %12 = vsyncpa [#allocation6 + $0x1], 0 }
   0x2   :  { %13 = vsyncpa [#allocation9], 0 }
   0x3   :  { %14 = vsyncpa [#allocation12], 0 }
   0x4   :  { %15 = vsyncpa [#allocation7], 0 }
   0x5   :  { %17 = vsyncpa [#allocation7 + $0x1], 0  ;;  %s1522_s18 = smov 0   ;;  %s1524_s19 = smov 0  }
   0x6   :  { %s1526_s20 = smov 0   ;;  %s1528_s21 = smov 0  }
   0x7 LB: > { %s1543_s22 = sadd.s32 4294967295, %s1475_s21   ;;  %s1055_s23 = sadd.s32 4294967294, %s1475_s21   ;;  %s1475_s21 = sphi %s1528_s21, %s1824_s21   ;;  %s1471_s20 = sphi %s1526_s20, %s1823_s20   ;;  %s1467_s19 = sphi %s1524_s19, %s1822_s19   ;;  %s1463_s18 = sphi %s1522_s18, %s1821_s18  }
   0x8   : > { %p43_p0 = scmp.ne.s32.totalorder %s1467_s19, %s1463_s18  ;;  %p1801_p1 = scmp.eq.s32.totalorder %s1543_s22, 0 }
   0x9   : > { %p157_p3 = scmp.eq.s32.totalorder %s1055_s23, 1  ;;  %p1056_p5 = scmp.ge.s32.totalorder %s1475_s21, 1 }
   0xa   : > { %p1552_p4 = por %p1801_p1, %p43_p0  ;;  %p164_p7 = scmp.lt.s32.totalorder %s1475_s21, 3 }
   0xb   : > { %p1557_p6 = por %p157_p3, %p43_p0  ;;  %s1477_s27 = smov [#allocation8]  }
   0xc   : > { %s1805_s24 = scalar_select %p1552_p4, 1, 0 }
   0xd   : > { %s1806_s25 = scalar_select %p1557_p6, 1, 0 }
   0xe   : > { %p1562_p8 = pnand %p1056_p5, %p164_p7  ;;  %s176_s28 = sshll.u32 %s1477_s27, 4  ;;  %s177_s28 = int_to_ptr.vmem [resolvable:$true] %s176_s28 }
   0xf   : > { %s1478_s30 = smov [#allocation10]   ;;  %s1479_s7 = smov [#allocation11]  }
  0x10   : > { %s1807_s26 = scalar_select %p1562_p8, 1, 0 }
  0x11   : > { %p1204_p9 = pneg %p1562_p8  ;;  %s189_s6 = sshll.u32 %s1478_s30, 4  ;;  %s190_s6 = int_to_ptr.vmem [resolvable:$true] %s189_s6 }
  0x12   : > { %s202_s8 = sshll.u32 %s1479_s7, 4  ;;  %s1308_s9 = scalar_lea.vmem %s177_s28, 256  ;;  %s203_s8 = int_to_ptr.vmem [resolvable:$true] %s202_s8 }
  0x13   : > { %p1571_p11 = pnand %p1204_p9, %p1801_p1  ;;  %p1309_p13 = scmp.ne.s32.totalorder %s177_s28, %s1308_s9 }
  0x14   : > { %p1316_p5 = scmp.lt.s32.totalorder %s177_s28, %s177_s28  ;;  %p1317_p7 = scmp.lt.s32.totalorder %s1308_s9, %s1308_s9 }
  0x15   : > { %p1299_p12 = pneg %p1571_p11 }
  0x16   : > { %p1318_p9 = por %p1317_p7, %p1316_p5 }
  0x17   : > { %p1311_p0 = pnand %p1309_p13, %p1299_p12 }
  0x19   : > { %p1312_p3 = pneg %p1311_p0 }
  0x1b   : > { %p1319_p10 = pnand %p1318_p9, %p1312_p3 }
  0x1d   : > { %1322 = shalt.err (!%p1319_p10)
}
  0x1e   : > { %s1480_s10 = smov 64   ;;  %s1481_s11 = smov 4  }
  0x1f   : > { %1207 = dma.hbm_to_vmem [thread:$0]  (!%p1571_p11), %s1796_s1, 256, %s177_s28, [#allocation9], %s1480_s10, %s1480_s10, %s1481_s11  }
  0x20   : > { %s1334_s14 = scalar_lea.vmem %s190_s6, 256  ;;  %p1342_p2 = scmp.lt.s32.totalorder %s190_s6, %s190_s6 }
  0x21   : > { %p1335_p1 = scmp.ne.s32.totalorder %s190_s6, %s1334_s14  ;;  %p1343_p6 = scmp.lt.s32.totalorder %s1334_s14, %s1334_s14 }
  0x23   : > { %p1337_p13 = pnand %p1335_p1, %p1299_p12  ;;  %p1344_p5 = por %p1343_p6, %p1342_p2 }
  0x25   : > { %p1338_p0 = pneg %p1337_p13 }
  0x27   : > { %p1345_p3 = pnand %p1344_p5, %p1338_p0 }
  0x29   : > { %1348 = shalt.err (!%p1345_p3)
}
  0x2a   : > { %1210 = dma.hbm_to_vmem [thread:$0]  (!%p1571_p11), %s1797_s2, 256, %s190_s6, [#allocation9], %s1480_s10, %s1480_s10, %s1481_s11  }
  0x2b   : > { %s1360_s17 = scalar_lea.vmem %s203_s8, 256  ;;  %p1368_p9 = scmp.lt.s32.totalorder %s203_s8, %s203_s8 }
  0x2c   : > { %p1361_p10 = scmp.ne.s32.totalorder %s203_s8, %s1360_s17  ;;  %p1369_p13 = scmp.lt.s32.totalorder %s1360_s17, %s1360_s17 }
  0x2e   : > { %p1363_p7 = pnand %p1361_p10, %p1299_p12  ;;  %p1370_p4 = por %p1369_p13, %p1368_p9 }
  0x30   : > { %p1364_p1 = pneg %p1363_p7 }
  0x32   : > { %p1371_p2 = pnand %p1370_p4, %p1364_p1 }
  0x34   : > { %1374 = shalt.err (!%p1371_p2)
}
  0x35   : > { %1213 = dma.hbm_to_vmem [thread:$0]  (!%p1571_p11), %s1798_s3, 256, %s203_s8, [#allocation12], %s1480_s10, %s1480_s10, %s1481_s11  }
  0x36   : > { %s1602_s28 = sadd.s32 1, %s1475_s21   ;;  %s30_s29 = sadd.s32 1, %s1471_s20 }
  0x37   : > { %s27_s30 = ssub.s32 %s1475_s21, %s1602_s28  ;;  %p37_p6 = scmp.ne.s32.totalorder %s1471_s20, %s1467_s19 }
  0x38   : > { %p28_p4 = scmp.eq.s32.totalorder %s27_s30, 0  ;;  %p38_p12 = scmp.eq.s32.totalorder %s1475_s21, 0 }
  0x39   : > { %p1225_p0 = scmp.lt.s32.totalorder %s1475_s21, 2  ;;  %p1809_p3 = scmp.eq.s32.totalorder %s1543_s22, 1 }
  0x3a   : > { %s1612_s6 = scalar_select %p28_p4, %s1471_s20, %s30_s29  }
  0x3b   : > { %p39_p5 = por %p38_p12, %p37_p6  ;;  %p1616_p10 = por %p1809_p3, %p37_p6 }
  0x3c   : > { %s219_s9 = sand.u32 1, %s1471_s20   ;;  %s1062_s12 = sshll.u32 %s1475_s21, 7 }
  0x3d   : > { %s1810_s7 = scalar_select %p1616_p10, 1, 0 }
  0x3e   : > { %s1061_s8 = sshll.u32 %s219_s9, 3  ;;  %s1625_s13 = scalar_lea.hbm %s1795_s0, %s1062_s12 }
  0x3f   : > { %s223_s14 = scalar_lea.vmem [#allocation5], %s1061_s8  ;;  %p1627_p11 = pnand %p1225_p0, %p39_p5 }
  0x40   : > { %s230_s15 = sshll.u32 %s223_s14, 4  ;;  %s220_s17 = scalar_lea.sflag [#allocation6], %s219_s9  ;;  %s231_s15 = int_to_ptr.vmem [resolvable:$true] %s230_s15 }
  0x41   : > { %s1375_s23 = scalar_lea.hbm %s1625_s13, 128  ;;  %p1377_p1 = pneg %p1627_p11 }
  0x42   : > { %p1376_p7 = scmp.ne.s32.totalorder %s1625_s13, %s1375_s23  ;;  %s1380_s29 = scalar_lea.hbm %s1795_s0, 256 }
  0x43   : > { %p1381_p2 = scmp.lt.s32.totalorder %s1625_s13, %s1795_s0  ;;  %p1382_p4 = scmp.lt.s32.totalorder %s1380_s29, %s1375_s23 }
  0x44   : > { %p1378_p9 = pnand %p1377_p1, %p1376_p7 }
  0x45   : > { %p1383_p6 = por %p1382_p4, %p1381_p2 }
  0x46   : > { %p1379_p13 = pneg %p1378_p9 }
  0x48   : > { %p1384_p12 = pnand %p1383_p6, %p1379_p13 }
  0x4a   : > { %1387 = shalt.err (!%p1384_p12)
}
  0x4b   : > { %s1388_s10 = scalar_lea.vmem %s231_s15, 128  ;;  %s1482_s9 = smov [#allocation5]  }
  0x4c   : > { %p1389_p0 = scmp.ne.s32.totalorder %s231_s15, %s1388_s10  ;;  %s1393_s11 = sshll.u32 %s1482_s9, 4  ;;  %s1394_s11 = int_to_ptr.vmem [resolvable:$false] %s1393_s11 }
  0x4d   : > { %s1395_s14 = scalar_lea.vmem %s1394_s11, 256  ;;  %p1396_p7 = scmp.lt.s32.totalorder %s231_s15, %s1394_s11 }
  0x4e   : > { %p1391_p5 = pnand %p1389_p0, %p1377_p1  ;;  %p1397_p9 = scmp.lt.s32.totalorder %s1395_s14, %s1388_s10 }
  0x50   : > { %p1392_p3 = pneg %p1391_p5  ;;  %p1398_p10 = por %p1397_p9, %p1396_p7 }
  0x52   : > { %p1399_p8 = pnand %p1398_p10, %p1392_p3 }
  0x54   : > { %1402 = shalt.err (!%p1399_p8)
}
  0x55   : > { %1217 = dma.hbm_to_vmem [thread:$0]  (!%p1627_p11), %s1625_s13, 128, %s231_s15, %s220_s17  }
  0x56   : > { %p1812_p13 = scmp.ne.s32.totalorder %s1807_s26, 0 }
  0x57   : > { %s1648_s23 = sand.u32 (!%p1812_p13), 1, %s1467_s19   ;;  %p1813_p10 = scmp.ne.s32.totalorder (!%p1812_p13), %s1805_s24, 0 }
  0x58   : > { %239 = sbr.rel (%p1812_p13) target bundleno = 1524 (0x5f4), region = 40  ;;  %s1064_s27 = sshll.u32 (!%p1812_p13), %s1648_s23, 3 }
  0x59   : > { %s242_s30 = scalar_lea.sflag (!%p1812_p13), [#allocation6], %s1648_s23  ;;  %s245_s29 = scalar_lea.vmem (!%p1812_p13), [#allocation5], %s1064_s27 }
  0x5d   : > { %1446 = dma.done.wait (%p1813_p10), %s242_s30, 128  }
  0x5e   : > { %1448 = vsyncadd (%p1813_p10), %s242_s30, 4294967168  ;;  %p1814_p8 = scmp.eq.s32.totalorder %s1543_s22, 0 }
  0x60   : > { %1450 = dma.done.wait (%p1814_p8), [#allocation9], 512   ;;  %p1815_p11 = pmov %p1814_p8 }
  0x61   : > { %p1816_p1 = pmov %p1814_p8 }
  0x62   : > { %1452 = vsyncadd (%p1815_p11), [#allocation9], 4294966784 }
  0x63   : > { %1454 = dma.done.wait (%p1816_p1), [#allocation12], 256   ;;  %p1817_p2 = pmov %p1816_p1 }
  0x64   : > { %v1483_v0 = vmov 0.0   ;;  %vm1484_vm0 = vmmov 0   ;;  %v1275_v1 = vld [vmem:[#allocation8 + $0x8] sm:$0xff]   ;;  %v1276_v2 = vld [vmem:[#allocation8] sm:$0xff]   ;;  %v285_v3 = vld [vmem:[%s245_s29] sm:$0xff]  ;;  %vm303_vm1 = vcmask 261120   ;;  %v405_v20 = vlaneseq }
  0x65   : > { %1456 = vsyncadd (%p1817_p2), [#allocation12], 4294967040  ;;  %1116 = vmatprep.subr.bf16.mxu0 %v1483_v0  ;;  %1120 = vmatprep.mubr.msk.bf16.mxu0 %vm1484_vm0, %v1483_v0  ;;  %v286_v4 = vpack.c.bf16 %v285_v3, %v285_v3  ;;  %vm413_vm2 = vcmask 64512   ;;  %s1485_s24 = smov 104   ;;  %s1486_s26 = smov 120   ;;  %v1277_v12 = vld [vmem:[#allocation10 + $0x8] sm:$0xff]  }
  0x66   : > { %1124 = vmatprep.subr.bf16.mxu1 %v1483_v0  ;;  %1128 = vmatprep.mubr.msk.bf16.mxu1 %vm1484_vm0, %v1483_v0  ;;  %s1487_s13 = smov 112   ;;  %v1278_v13 = vld [vmem:[#allocation10] sm:$0xff]   ;;  %v406_v21 = vshrl.u32 %v405_v20, 7  ;;  %v408_v22 = vand.u32 127, %v405_v20  ;;  %vm474_vm4 = vcmask 1043456   ;;  %s1488_s15 = smov 8  }
  0x67   : > { %1117 = vmatpush3.bf16.msra.mxu0 %v1275_v1  ;;  %1125 = vmatpush3.bf16.msra.mxu1 %v1277_v12  ;;  %s1489_s16 = smov 16   ;;  %s1490_s17 = smov 24   ;;  %vm635_vm5 = vcmask 130112   ;;  %vm753_vm6 = vcmask 195712   ;;  %vm871_vm7 = vcmask 261312  }
  0x68   : > { %1118 = vmatprep.subr.bf16.mxu0 %v1483_v0  ;;  %1126 = vmatprep.subr.bf16.mxu1 %v1483_v0  ;;  %vm457_vm3 = vcmp.gt.s32.totalorder %v408_v22, %v406_v21  ;;  %s1088_s10 = sshll.u32 %s1543_s22, 7  ;;  %s283_s9 = scalar_lea.vmem [#allocation13], %s1064_s27 }
  0x69   : > { %s956_s11 = sshll.u32 %s283_s9, 4  ;;  %s1751_s29 = scalar_lea.hbm %s1800_s5, %s1088_s10  ;;  %s1753_s11 = int_to_ptr.vmem [resolvable:$true] %s956_s11 }
  0x6a   : > { %s943_s22 = scalar_lea.sflag [#allocation7], %s1648_s23  ;;  %p1818_p6 = scmp.ne.s32.totalorder %s1810_s7, 0 }
  0x6b   : > { %1119 = vmatpush3.bf16.msra.mxu0 %v1276_v2  ;;  %1127 = vmatpush3.bf16.msra.mxu1 %v1278_v13  ;;  %s1491_s27 = smov [#allocation13]  }
  0x6c   : > { %1132 = vmatprep.subr.bf16.mxu0 %v1483_v0  ;;  %1138 = vmatprep.subr.bf16.mxu1 %v1483_v0 }
  0x6e   : > { %1121 = vmatmul.mubr.msk.bf16.vlgmr.msra.gmra.mxu0 %vm303_vm1, %v286_v4  ;;  %1129 = vmatmul.mubr.msk.bf16.vlgmr.msra.gmra.mxu1 %vm303_vm1, %v286_v4 }
  0x6f   : > { %1134 = vmatprep.mubr.msk.bf16.mxu0 %vm1484_vm0, %v1483_v0  ;;  %1140 = vmatprep.mubr.msk.bf16.mxu1 %vm1484_vm0, %v1483_v0 }
 0x12e   : > { %v341_v5 = vpop.f32.mrf.mxu0  ;;  %v398_v50 = vpop.f32.mrf.mxu1 }
 0x12f   : > { %347 = vst.msk [vmem:[#allocation2] sm:$0xff] %vm303_vm1, %v341_v5  ;;  %404 = vst.msk [vmem:[#allocation3] sm:$0xff] %vm303_vm1, %v398_v50 }
 0x130   : > { %v1122_v6 = vpop.f32.mrf.mxu0  ;;  %v1130_v51 = vpop.f32.mrf.mxu1 }
 0x132   : > { %v344_v7 = vpop.f32.mrf.mxu0  ;;  %v401_v52 = vpop.f32.mrf.mxu1 }
 0x134   : > { %v1123_v8 = vpop.f32.mrf.mxu0  ;;  %v1131_v53 = vpop.f32.mrf.mxu1 }
 0x136   : > { %v755_v9 = vld [vmem:[#allocation2] sm:$0xff]  ;;  %v639_v54 = vld [vmem:[#allocation3] sm:$0xff] }
 0x137   : > { %v756_v10 = vpack.c.bf16 %v755_v9, %v755_v9  ;;  %v640_v57 = vpack.c.bf16 %v639_v54, %v639_v54 }
 0x139   : > { %760 = vrot.lane.b32.xlu1 %v756_v10, %s1485_s24  ;;  %524 = vrot.lane.b32.xlu0 %v756_v10, %s1486_s26  ;;  %v415_v11 = vsel %vm413_vm2, %v756_v10, 0  ;;  %v476_v58 = vsel %vm474_vm4, %v640_v57, 0 }
 0x13a   : > { %1133 = vmatpush3.bf16.xpose.msra.mxu0 %v415_v11  ;;  %1139 = vmatpush3.bf16.msra.mxu1 %v476_v58 }
 0x13b   : > { %1144 = vmatprep.subr.bf16.mxu0 %v1483_v0  ;;  %1150 = vmatprep.subr.bf16.mxu1 %v1483_v0 }
 0x13d   : > { %642 = vrot.lane.b32.xlu0 %v756_v10, %s1487_s13 }
 0x141   : > { %1135 = vmatmul.mubr.msk.bf16.vlgmr.msra.gmra.mxu0 %vm413_vm2, %v756_v10 }
 0x142   : > { %1146 = vmatprep.mubr.msk.bf16.mxu0 %vm1484_vm0, %v1483_v0 }
 0x1ab   : > { %v525_v14 = vpop.permute.xlu0 %524  ;;  %v761_v18 = vpop.permute.xlu1 %760 }
 0x1ac   : > { %v527_v15 = vsel %vm413_vm2, %v525_v14, 0  ;;  %v763_v19 = vsel %vm413_vm2, %v761_v18, 0 }
 0x1ad   : > { %1145 = vmatpush3.bf16.xpose.msra.mxu0 %v527_v15 }
 0x1ae   : > { %1156 = vmatprep.subr.bf16.mxu0 %v1483_v0 }
 0x1af   : > { %v643_v16 = vpop.permute.xlu0 %642 }
 0x1b0   : > { %v645_v17 = vsel %vm413_vm2, %v643_v16, 0 }
 0x1b4   : > { %1147 = vmatmul.mubr.msk.bf16.vlgmr.msra.gmra.mxu0 %vm413_vm2, %v525_v14 }
 0x1b5   : > { %1157 = vmatpush3.bf16.xpose.msra.mxu0 %v645_v17  ;;  %1158 = vmatprep.mubr.msk.bf16.mxu0 %vm1484_vm0, %v1483_v0 }
 0x1b6   : > { %1168 = vmatprep.subr.bf16.mxu0 %v1483_v0 }
 0x1bc   : > { %1159 = vmatmul.mubr.msk.bf16.vlgmr.msra.gmra.mxu0 %vm413_vm2, %v643_v16 }
 0x1bd   : > { %1169 = vmatpush3.bf16.xpose.msra.mxu0 %v763_v19  ;;  %1170 = vmatprep.mubr.msk.bf16.mxu0 %vm1484_vm0, %v1483_v0 }
 0x1be   : > { %1180 = vmatprep.subr.bf16.mxu0 %v1483_v0 }
 0x1c4   : > { %1171 = vmatmul.mubr.msk.bf16.vlgmr.msra.gmra.mxu0 %vm413_vm2, %v761_v18 }
 0x1c5   : > { %1184 = vmatprep.mubr.msk.bf16.mxu0 %vm1484_vm0, %v1483_v0 }
 0x201   : > { %v451_v23 = vpop.f32.mrf.mxu0 }
 0x202   : > { %v458_v24 = vsel %vm457_vm3, -inf, %v451_v23 }
 0x203   : > { %v1136_v25 = vpop.f32.mrf.mxu0  ;;  %v459_v26 = vsel %vm413_vm2, %v458_v24, -inf }
 0x204   : > { %460 = vmax.xlane.f32.xlu1 %v459_v26 }
 0x205   : > { %v454_v27 = vpop.f32.mrf.mxu0 }
 0x207   : > { %v1137_v28 = vpop.f32.mrf.mxu0 }
 0x274   : > { %v563_v29 = vpop.f32.mrf.mxu0 }
 0x275   : > { %v569_v30 = vsel %vm457_vm3, -inf, %v563_v29 }
 0x276   : > { %v1148_v31 = vpop.f32.mrf.mxu0  ;;  %v570_v32 = vsel %vm413_vm2, %v569_v30, -inf }
 0x277   : > { %571 = vmax.xlane.f32.xlu0 %v570_v32 }
 0x278   : > { %v566_v33 = vpop.f32.mrf.mxu0 }
 0x27a   : > { %v1149_v34 = vpop.f32.mrf.mxu0 }
 0x27c   : > { %v681_v35 = vpop.f32.mrf.mxu0 }
 0x27d   : > { %v687_v36 = vsel %vm457_vm3, -inf, %v681_v35 }
 0x27e   : > { %v1160_v37 = vpop.f32.mrf.mxu0  ;;  %v688_v38 = vsel %vm413_vm2, %v687_v36, -inf }
 0x27f   : > { %689 = vmax.xlane.f32.xlu0 %v688_v38 }
 0x280   : > { %v684_v39 = vpop.f32.mrf.mxu0 }
 0x282   : > { %v1161_v40 = vpop.f32.mrf.mxu0 }
 0x284   : > { %v799_v41 = vpop.f32.mrf.mxu0 }
 0x285   : > { %v805_v42 = vsel %vm457_vm3, -inf, %v799_v41 }
 0x286   : > { %v1172_v43 = vpop.f32.mrf.mxu0  ;;  %v806_v44 = vsel %vm413_vm2, %v805_v42, -inf }
 0x287   : > { %807 = vmax.xlane.f32.xlu1 %v806_v44 }
 0x288   : > { %v802_v45 = vpop.f32.mrf.mxu0 }
 0x289   : > { %v1279_v45 = vld [vmem:[#allocation11 + $0x8] sm:$0xff]  }
 0x28a   : > { %v1173_v46 = vpop.f32.mrf.mxu0  ;;  %1181 = vmatpush3.bf16.msra.mxu0 %v1279_v45 }
 0x28b   : > { %v1280_v46 = vld [vmem:[#allocation11] sm:$0xff]   ;;  %1182 = vmatprep.subr.bf16.mxu0 %v1483_v0 }
 0x28d   : > { %v461_v47 = vpop.xlane.xlu1 %460 }
 0x28e   : > { %v462_v48 = vsub.f32 %v458_v24, %v461_v47  ;;  %1183 = vmatpush3.bf16.msra.mxu0 %v1280_v46 }
 0x290   : > { %v463_v49 = vmul.f32 1.442695, %v462_v48 }
 0x292   : > { %1281 = vpow2.f32 %v463_v49 }
 0x29f   : > { %v1282_v55 = vpop.eup %1281 }
 0x2a0   : > { %v465_v56 = vsel %vm413_vm2, %v1282_v55, 0.0 }
 0x2a1   : > { %466 = vadd.xlane.f32.xlu0 %v465_v56 }
 0x300   : > { %v572_v59 = vpop.xlane.xlu0 %571 }
 0x301   : > { %v573_v60 = vsub.f32 %v569_v30, %v572_v59 }
 0x303   : > { %v574_v61 = vmul.f32 1.442695, %v573_v60 }
 0x305   : > { %1283 = vpow2.f32 %v574_v61 }
 0x308   : > { %v690_v62 = vpop.xlane.xlu0 %689 }
 0x309   : > { %v691_v63 = vsub.f32 %v687_v36, %v690_v62 }
 0x30b   : > { %v692_v1 = vmul.f32 1.442695, %v691_v63 }
 0x30d   : > { %1285 = vpow2.f32 %v692_v1 }
 0x310   : > { %v808_v7 = vpop.xlane.xlu1 %807 }
 0x311   : > { %v809_v8 = vsub.f32 %v805_v42, %v808_v7 }
 0x312   : > { %v1284_v2 = vpop.eup %1283 }
 0x313   : > { %v576_v3 = vsel %vm413_vm2, %v1284_v2, 0.0  ;;  %v810_v9 = vmul.f32 1.442695, %v809_v8 }
 0x314   : > { %577 = vadd.xlane.f32.xlu1 %v576_v3 }
 0x31a   : > { %v1286_v4 = vpop.eup %1285 }
 0x31b   : > { %v694_v5 = vsel %vm413_vm2, %v1286_v4, 0.0 }
 0x31c   : > { %695 = vadd.xlane.f32.xlu0 %v694_v5 }
 0x325   : > { %701 = vrot.lane.b32.xlu1 %v640_v57, %s1487_s13 }
 0x32a   : > { %v467_v6 = vpop.xlane.xlu0 %466 }
 0x32b   : > { %1287 = vrcp.f32 %v467_v6 }
 0x32c   : > { %1289 = vpow2.f32 %v810_v9 }
 0x332   : > { %583 = vrot.lane.b32.xlu0 %v640_v57, %s1486_s26  ;;  %s1407_s26 = sshll.u32 %s1491_s27, 4  ;;  %s1408_s26 = int_to_ptr.vmem [resolvable:$false] %s1407_s26 }
 0x333   : > { %s1409_s13 = scalar_lea.vmem %s1408_s26, 256  ;;  %p1410_p5 = scmp.lt.s32.totalorder %s1753_s11, %s1408_s26 }
 0x338   : > { %v1288_v10 = vpop.eup %1287 }
 0x339   : > { %v469_v11 = vmul.f32 %v1288_v10, %v1282_v55  ;;  %v1290_v13 = vpop.eup %1289  ;;  %v1083_v55 = vld [vmem:[%s1799_s4] ss:$0 sm:$0xff] }
 0x33a   : > { %v812_v14 = vsel %vm413_vm2, %v1290_v13, 0.0 }
 0x33b   : > { %v470_v12 = vpack.c.bf16 %v469_v11, %v469_v11 }
 0x33d   : > { %1141 = vmatmul.mubr.msk.bf16.vlgmr.msra.gmra.mxu1 %vm413_vm2, %v470_v12 }
 0x33e   : > { %1152 = vmatprep.mubr.msk.bf16.mxu1 %vm1484_vm0, %v1483_v0 }
 0x349   : > { %813 = vadd.xlane.f32.xlu1 %v812_v14 }
 0x35a   : > { %819 = vrot.lane.b32.xlu1 %v640_v57, %s1485_s24  ;;  %s1403_s24 = scalar_lea.vmem %s1753_s11, 128 }
 0x35b   : > { %p1404_p4 = scmp.ne.s32.totalorder %s1753_s11, %s1403_s24  ;;  %p1411_p3 = scmp.lt.s32.totalorder %s1409_s13, %s1403_s24 }
 0x35d   : > { %p1405_p12 = pnand %p1404_p4, %p1818_p6  ;;  %p1412_p7 = por %p1411_p3, %p1410_p5 }
 0x35f   : > { %p1406_p0 = pneg %p1405_p12 }
 0x361   : > { %p1413_p9 = pnand %p1412_p7, %p1406_p0 }
 0x39d   : > { %v578_v15 = vpop.xlane.xlu1 %577 }
 0x39e   : > { %1291 = vrcp.f32 %v578_v15 }
 0x3a1   : > { %v702_v21 = vpop.permute.xlu1 %701 }
 0x3a2   : > { %v707_v23 = vsel %vm474_vm4, %v702_v21, 0 }
 0x3a5   : > { %v696_v16 = vpop.xlane.xlu0 %695 }
 0x3a6   : > { %1293 = vrcp.f32 %v696_v16 }
 0x3a9   : > { %v584_v17 = vpop.permute.xlu0 %583 }
 0x3aa   : > { %v589_v18 = vsel %vm474_vm4, %v584_v17, 0 }
 0x3ab   : > { %v1292_v19 = vpop.eup %1291  ;;  %1151 = vmatpush3.bf16.msra.mxu1 %v589_v18 }
 0x3ac   : > { %1162 = vmatprep.subr.bf16.mxu1 %v1483_v0  ;;  %v580_v20 = vmul.f32 %v1292_v19, %v1284_v2 }
 0x3ae   : > { %v581_v22 = vpack.c.bf16 %v580_v20, %v580_v20 }
 0x3b0   : > { %1153 = vmatmul.mubr.msk.bf16.vlgmr.msra.gmra.mxu1 %vm413_vm2, %v581_v22 }
 0x3b1   : > { %1163 = vmatpush3.bf16.msra.mxu1 %v707_v23  ;;  %1164 = vmatprep.mubr.msk.bf16.mxu1 %vm1484_vm0, %v1483_v0 }
 0x3b2   : > { %1174 = vmatprep.subr.bf16.mxu1 %v1483_v0 }
 0x3b3   : > { %v1294_v24 = vpop.eup %1293 }
 0x3b4   : > { %v698_v25 = vmul.f32 %v1294_v24, %v1286_v4 }
 0x3b6   : > { %v699_v26 = vpack.c.bf16 %v698_v25, %v698_v25 }
 0x3b8   : > { %1165 = vmatmul.mubr.msk.bf16.vlgmr.msra.gmra.mxu1 %vm413_vm2, %v699_v26 }
 0x3b9   : > { %1176 = vmatprep.mubr.msk.bf16.mxu1 %vm1484_vm0, %v1483_v0 }
 0x3d2   : > { %v814_v27 = vpop.xlane.xlu1 %813 }
 0x3d3   : > { %1295 = vrcp.f32 %v814_v27 }
 0x3d6   : > { %v820_v28 = vpop.permute.xlu1 %819 }
 0x3d7   : > { %v825_v29 = vsel %vm474_vm4, %v820_v28, 0 }
 0x3d8   : > { %1175 = vmatpush3.bf16.msra.mxu1 %v825_v29 }
 0x3e0   : > { %v1296_v30 = vpop.eup %1295 }
 0x3e1   : > { %v816_v31 = vmul.f32 %v1296_v30, %v1290_v13 }
 0x3e3   : > { %v817_v32 = vpack.c.bf16 %v816_v31, %v816_v31 }
 0x3e5   : > { %1177 = vmatmul.mubr.msk.bf16.vlgmr.msra.gmra.mxu1 %vm413_vm2, %v817_v32 }
 0x3fd   : > { %v512_v33 = vpop.f32.mrf.mxu1 }
 0x3fe   : > { %518 = vst.msk [vmem:[#allocation4] sm:$0xff] %vm413_vm2, %v512_v33 }
 0x3ff   : > { %v1142_v34 = vpop.f32.mrf.mxu1 }
 0x401   : > { %v515_v35 = vpop.f32.mrf.mxu1 }
 0x403   : > { %v1143_v36 = vpop.f32.mrf.mxu1 }
 0x470   : > { %v625_v37 = vpop.f32.mrf.mxu1 }
 0x471   : > { %632 = vrot.lane.b32.xlu0 %v625_v37, %s1488_s15 }
 0x472   : > { %v1154_v38 = vpop.f32.mrf.mxu1 }
 0x474   : > { %v628_v39 = vpop.f32.mrf.mxu1 }
 0x476   : > { %v1155_v40 = vpop.f32.mrf.mxu1 }
 0x478   : > { %v743_v41 = vpop.f32.mrf.mxu1 }
 0x479   : > { %750 = vrot.lane.b32.xlu1 %v743_v41, %s1489_s16 }
 0x47a   : > { %v1166_v42 = vpop.f32.mrf.mxu1 }
 0x47c   : > { %v746_v43 = vpop.f32.mrf.mxu1 }
 0x47e   : > { %v1167_v44 = vpop.f32.mrf.mxu1 }
 0x4a5   : > { %v861_v47 = vpop.f32.mrf.mxu1 }
 0x4a6   : > { %868 = vrot.lane.b32.xlu0 %v861_v47, %s1490_s17 }
 0x4a7   : > { %v1178_v48 = vpop.f32.mrf.mxu1 }
 0x4a9   : > { %v864_v49 = vpop.f32.mrf.mxu1 }
 0x4ab   : > { %v1179_v50 = vpop.f32.mrf.mxu1 }
 0x4e3   : > { %v633_v51 = vpop.permute.xlu0 %632 }
 0x4e4   : > { %636 = vst.msk [vmem:[#allocation4] sm:$0xff] %vm635_vm5, %v633_v51 }
 0x4eb   : > { %v751_v52 = vpop.permute.xlu1 %750 }
 0x4ec   : > { %754 = vst.msk [vmem:[#allocation4] sm:$0xff] %vm753_vm6, %v751_v52 }
 0x518   : > { %v869_v53 = vpop.permute.xlu0 %868 }
 0x519   : > { %872 = vst.msk [vmem:[#allocation4] sm:$0xff] %vm871_vm7, %v869_v53 }
 0x520   : > { %v873_v0 = vld [vmem:[#allocation4] sm:$0xff] }
 0x521   : > { %v874_v54 = vpack.c.bf16 %v873_v0, %v873_v0 }
 0x523   : > { %1185 = vmatmul.mubr.msk.bf16.vlgmr.msra.gmra.mxu0 %vm303_vm1, %v874_v54 }
 0x5e3   : > { %v935_v56 = vpop.f32.mrf.mxu0 }
 0x5e4   : > { %v936_v57 = vadd.f32 %v1083_v55, %v935_v56 }
 0x5e5   : > { %v1186_v58 = vpop.f32.mrf.mxu0 }
 0x5e6   : > { %941 = vst.msk [vmem:[%s283_s9] sm:$0xff] %vm303_vm1, %v936_v57 }
 0x5e7   : > { %v938_v59 = vpop.f32.mrf.mxu0 }
 0x5e8   : > { %1416 = shalt.err (!%p1413_p9)
}
 0x5e9   : > { %s1417_s15 = scalar_lea.hbm %s1751_s29, 128  ;;  %s1421_s17 = scalar_lea.hbm %s1800_s5, 256 }
 0x5ea   : > { %p1418_p13 = scmp.ne.s32.totalorder %s1751_s29, %s1417_s15  ;;  %p1422_p11 = scmp.lt.s32.totalorder %s1751_s29, %s1800_s5 }
 0x5eb   : > { %p1423_p1 = scmp.lt.s32.totalorder %s1421_s17, %s1417_s15 }
 0x5ec   : > { %p1419_p10 = pnand %p1418_p13, %p1818_p6 }
 0x5ed   : > { %p1424_p2 = por %p1423_p1, %p1422_p11 }
 0x5ee   : > { %p1420_p8 = pneg %p1419_p10 }
 0x5f0   : > { %p1425_p4 = pnand %p1424_p2, %p1420_p8 }
 0x5f2   : > { %1428 = shalt.err (!%p1425_p4)
}
 0x5f3   : > { %1202 = dma.vmem_to_hbm [thread:$0]  (%p1818_p6), %s1753_s11, 128, %s1751_s29, %s943_s22   ;;  %v1187_v60 = vpop.f32.mrf.mxu0 }
 0x5f4 PF: > { %s968_s10 = sand.u32 1, %s1463_s18   ;;  %p1819_p12 = scmp.ne.s32.totalorder %s1806_s25, 0 }
 0x5f5   : > { %p1820_p0 = scmp.ge.s32.totalorder %s1475_s21, 2  ;;  %s969_s9 = scalar_lea.sflag [#allocation7], %s968_s10 }
 0x5f7   : > { %p1219_p5 = pnand %p1820_p0, %p1819_p12 }
 0x5f9   : > { %p1220_p3 = pneg %p1219_p5 }
 0x5fb   : > { %1458 = dma.done.wait (%p1220_p3), %s969_s9, 128  }
 0x5fc   : > { %1460 = vsyncadd (%p1220_p3), %s969_s9, 4294967168  ;;  %p20_p7 = scmp.ge.s32.totalorder %s1602_s28, 4   ;;  %s1821_s18 = smov %s1467_s19 }
 0x5fd   : > { %s1822_s19 = smov %s1471_s20  ;;  %s1823_s20 = smov %s1612_s6 }
 0x5fe   : > { %s1824_s21 = smov %s1602_s28  ;;  %22 = sbr.rel (!%p20_p7) target bundleno = 7 (0x7), region = 97 }
 0x603   :  { %974 = vsyncpa [#allocation6], 1 }
 0x604   :  { %976 = vsyncpa [#allocation6 + $0x1], 1 }
 0x605   :  { %977 = vsyncpa [#allocation9], 1 }
 0x606   :  { %978 = vsyncpa [#allocation12], 1 }
 0x607   :  { %979 = vsyncpa [#allocation7], 1 }
 0x608   :  { %981 = vsyncpa [#allocation7 + $0x1], 1 }

</bundles_post_ra>
